<compile_context>
chip_gen: v7x
topology: tpu7x:2x2x1
jax: 0.10.0
libtpu: 0.0.40
codegen_flags: <defaults>
</compile_context>

<pallas_src>
import math
import functools

import jax
import jax.numpy as jnp
from jax import lax
from jax.experimental import pallas as pl
from jax.experimental.pallas import tpu as pltpu


# ---------------------------------------------------------------------------
# Kernel
# ---------------------------------------------------------------------------
def _rel_attn_kernel(*refs, num_heads, head_dim, has_bias, compute_dtype):
    """One grid step handles one (batch, query-tile, head) block."""
    if has_bias:
        (x_ref, k_ref, v_ref, bias_ref, wq_ref, bq_ref, wf_ref, bf_ref,
         o_ref, q_sc, acc_sc) = refs
    else:
        (x_ref, k_ref, v_ref, wq_ref, bq_ref, wf_ref, bf_ref,
         o_ref, q_sc, acc_sc) = refs
        bias_ref = None

    cdt = compute_dtype
    D = head_dim
    approx = jnp.dtype(cdt) != jnp.dtype(jnp.float32)
    h = pl.program_id(2)

    # First head of each query tile: one full-width Q projection (MXU, K = C,
    # N = C — this is where MXU efficiency is earned), split into per-head
    # slabs in a VMEM scratch, and zero the f32 output accumulator.
    @pl.when(h == 0)
    def _init():
        x = x_ref[0]                                                  # (tq, C)
        qf = (jnp.dot(x, wq_ref[...], preferred_element_type=jnp.float32)
              + bq_ref[...]).astype(cdt)                              # scale pre-folded
        for hh in range(num_heads):                                   # small static loop
            q_sc[hh] = qf[:, hh * D:(hh + 1) * D]
        acc_sc[...] = jnp.zeros_like(acc_sc)

    qh = q_sc[h]                      # (tq, D)   this head's queries
    kh = k_ref[h]                     # (N2, D)   precomputed keys (per batch)
    vh = v_ref[h]                     # (N2, D)   precomputed values

    # QK^T without an explicit transpose: contract over D directly.
    sim = lax.dot_general(qh, kh, dimension_numbers=(((1,), (1,)), ((), ())),
                          preferred_element_type=jnp.float32)         # (tq, N2)
    if has_bias:
        sim = sim + bias_ref[0, 0].astype(jnp.float32)                # upcast at add
    sim = sim - jnp.max(sim, axis=-1, keepdims=True)
    p = jnp.exp(sim)
    denom = jnp.sum(p, axis=-1, keepdims=True)                        # (tq, 1)

    # Un-normalized PV matmul, then normalize the small (tq, D) result instead
    # of the (tq, N2) probability matrix.
    oh = jnp.dot(p.astype(cdt), vh, preferred_element_type=jnp.float32)
    oh = oh * pl.reciprocal(denom, approx=approx)

    # Fold this head's final-projection slice into the f32 accumulator.
    acc_sc[...] += jnp.dot(oh.astype(cdt), wf_ref[0],
                           preferred_element_type=jnp.float32)        # (tq, C)

    @pl.when(h == num_heads - 1)
    def _finalize():
        o_ref[0] = (acc_sc[...] + bf_ref[...]).astype(o_ref.dtype)


# ---------------------------------------------------------------------------
# Host-side helpers
# ---------------------------------------------------------------------------
def _round_up(a, m):
    return (a + m - 1) // m * m


def _max_q_tile():
    """Generation-aware maximum query tile (128 on v5e, 256 on v6e/v7x)."""
    try:
        kind = jax.devices()[0].device_kind.lower()
    except Exception:
        return 256
    if "v5 lite" in kind or "v5lite" in kind or "v5e" in kind:
        return 128
    return 256


def _vmem_cap_bytes():
    try:
        return int(pltpu.get_tpu_info().vmem_capacity_bytes)
    except Exception:
        return 64 << 20          # conservative (v7x physical VMEM per core)


def _vmem_limit_bytes(tq, n2, c, h, d, has_bias, cdt, out_itemsize):
    """Block footprint + in-kernel f32 intermediates, capped by physical VMEM."""
    itm = jnp.dtype(cdt).itemsize
    lane = 128
    d_p = _round_up(d, lane)          # lane padding of D-wide slabs
    c_p = _round_up(c, lane)
    n2_p = _round_up(n2, lane)

    blocks = 0
    blocks += 2 * tq * c_p * itm                      # x tile (double-buffered)
    blocks += 2 * 2 * h * n2 * d_p * itm              # K and V per-batch slabs
    if has_bias:
        blocks += 2 * tq * n2_p * itm                 # per-head bias slice
    blocks += c * c_p * itm + c_p * 4                 # wq + bq (single-buffered)
    blocks += 2 * d * c_p * itm                       # wf per-head slice
    blocks += c_p * 4                                 # bf (single-buffered)
    blocks += 2 * tq * c_p * out_itemsize             # output tile

    scratch = h * tq * d_p * itm + tq * c_p * 4       # q_sc + f32 accumulator
    interm = (tq * c_p * 4                            # f32 Q projection
              + 2 * tq * n2_p * 4                     # sim + p (f32)
              + tq * n2_p * itm                       # p cast to compute dtype
              + 2 * tq * c_p * 4)                     # final-proj product
    est = blocks + scratch + interm + (4 << 20)       # + headroom
    cap = _vmem_cap_bytes() - (4 << 20)
    return int(min(cap, max(16 << 20, est)))


def _maybe_single_buffered(shape, index_map):
    """BlockSpec with Buffered(1) for grid-invariant operands (safe fallback)."""
    try:
        return pl.BlockSpec(shape, index_map, pipeline_mode=pl.Buffered(1))
    except (TypeError, AttributeError):
        return pl.BlockSpec(shape, index_map)


# ---------------------------------------------------------------------------
# Public wrapper
# ---------------------------------------------------------------------------
def relative_attention(x, context, params, *, num_heads, attn_bias=None,
                       compute_dtype=jnp.bfloat16, q_tile=None):
    """Pallas-backed forward of RelativeAttention.

    x:       (B, N1, C)
    context: (B, N2, C)
    params:  wq/wk/wv/wf stored transposed as (C_in, C_out); bq/bk/bv/bf (C,).
    attn_bias: optional (B, H, N1, N2); when None a specialized kernel without
               the bias operand is compiled.
    """
    B, N1, C = x.shape
    _, N2, _ = context.shape
    assert C % num_heads == 0
    H = num_heads
    D = C // H
    scale = 1.0 / math.sqrt(D)
    cdt = jnp.dtype(compute_dtype)
    out_dtype = x.dtype
    has_bias = attn_bias is not None

    # ---- host-side prep (cheap XLA ops around the kernel) -------------------
    # Softmax scale folded into the (in-kernel) Q projection.
    wq = (params["wq"] * scale).astype(cdt)
    bq = (params["bq"] * scale).reshape(1, C).astype(jnp.float32)
    # K/V projections hoisted out of the kernel: computed ONCE per batch here
    # instead of once per query tile, then laid out per head.
    k = (context @ params["wk"] + params["bk"]).astype(cdt)            # (B, N2, C)
    v = (context @ params["wv"] + params["bv"]).astype(cdt)
    k = k.reshape(B, N2, H, D).transpose(0, 2, 1, 3).reshape(B * H, N2, D)
    v = v.reshape(B, N2, H, D).transpose(0, 2, 1, 3).reshape(B * H, N2, D)
    wf = params["wf"].astype(cdt).reshape(H, D, C)                     # per-head slices
    bf = params["bf"].reshape(1, C).astype(jnp.float32)
    x_c = x.astype(cdt)

    # Query tiling: generation-aware max tile; pad N1 so any length is legal.
    tq = q_tile if q_tile is not None else min(_max_q_tile(), _round_up(N1, 8))
    N1p = _round_up(N1, tq)
    if N1p != N1:
        x_c = jnp.pad(x_c, ((0, 0), (0, N1p - N1), (0, 0)))
    nqt = N1p // tq

    bias_c = None
    if has_bias:
        bias_c = attn_bias.astype(cdt)      # stream in compute dtype (bf16 halves bytes)
        if N1p != N1:
            bias_c = jnp.pad(bias_c, ((0, 0), (0, 0), (0, N1p - N1), (0, 0)))

    kernel = functools.partial(_rel_attn_kernel, num_heads=H, head_dim=D,
                               has_bias=has_bias, compute_dtype=cdt)

    # ---- specs ---------------------------------------------------------------
    in_specs = [
        pl.BlockSpec((1, tq, C), lambda b, qi, h: (b, qi, 0)),        # x query tile
        pl.BlockSpec((H, N2, D), lambda b, qi, h: (b, 0, 0)),         # K (per batch)
        pl.BlockSpec((H, N2, D), lambda b, qi, h: (b, 0, 0)),         # V (per batch)
    ]
    args = [x_c, k, v]
    if has_bias:
        # Per-head bias slice: streamed/double-buffered by the grid pipeline.
        in_specs.append(pl.BlockSpec((1, 1, tq, N2), lambda b, qi, h: (b, h, qi, 0)))
        args.append(bias_c)
    in_specs += [
        _maybe_single_buffered((C, C), lambda b, qi, h: (0, 0)),      # wq (pre-scaled)
        _maybe_single_buffered((1, C), lambda b, qi, h: (0, 0)),      # bq (pre-scaled)
        pl.BlockSpec((1, D, C), lambda b, qi, h: (h, 0, 0)),          # wf per head
        _maybe_single_buffered((1, C), lambda b, qi, h: (0, 0)),      # bf
    ]
    args += [wq, bq, wf, bf]

    # ---- cost estimate / VMEM limit -------------------------------------------
    itm = cdt.itemsize
    flops = 4 * B * N1p * C * C + 4 * B * N1p * N2 * C
    transcendentals = B * H * N1p * N2
    bytes_accessed = (B * N1p * C * itm + 2 * B * N2 * C * itm + 2 * C * C * itm
                      + B * N1p * C * jnp.dtype(out_dtype).itemsize)
    if has_bias:
        bytes_accessed += B * H * N1p * N2 * itm

    out = pl.pallas_call(
        kernel,
        out_shape=jax.ShapeDtypeStruct((B, N1p, C), out_dtype),
        grid=(B, nqt, H),
        in_specs=in_specs,
        out_specs=pl.BlockSpec((1, tq, C), lambda b, qi, h: (b, qi, 0)),
        scratch_shapes=[pltpu.VMEM((H, tq, D), cdt),          # per-head Q
                        pltpu.VMEM((tq, C), jnp.float32)],    # output accumulator
        compiler_params=pltpu.CompilerParams(
            dimension_semantics=("parallel", "parallel", "arbitrary"),
            vmem_limit_bytes=_vmem_limit_bytes(
                tq, N2, C, H, D, has_bias, cdt, jnp.dtype(out_dtype).itemsize)),
        cost_estimate=pl.CostEstimate(flops=int(flops),
                                      transcendentals=int(transcendentals),
                                      bytes_accessed=int(bytes_accessed)),
    )(*args)

    if N1p != N1:
        out = out[:, :N1]
    return out


# ---------------------------------------------------------------------------
# Pure-JAX reference & synthetic init
# ---------------------------------------------------------------------------
def _reference(x, context, params, *, num_heads, attn_bias=None):
    """Plain-JAX reference mirroring the PyTorch forward."""
    B, N1, C = x.shape
    _, N2, _ = context.shape
    D = C // num_heads
    scale = 1.0 / math.sqrt(D)

    def proj(t, w, b):
        y = t @ w + b
        return y.reshape(t.shape[0], t.shape[1], num_heads, D)

    q = proj(x, params["wq"], params["bq"]).transpose(0, 2, 1, 3)        # (B,H,N1,D)
    k = proj(context, params["wk"], params["bk"]).transpose(0, 2, 1, 3)  # (B,H,N2,D)
    v = proj(context, params["wv"], params["bv"]).transpose(0, 2, 1, 3)  # (B,H,N2,D)
    sim = jnp.einsum("bhqd,bhkd->bhqk", q, k) * scale
    if attn_bias is not None:
        sim = sim + attn_bias
    attn = jax.nn.softmax(sim, axis=-1)
    o = jnp.einsum("bhqk,bhkd->bhqd", attn, v)
    o = o.transpose(0, 2, 1, 3).reshape(B, N1, C)
    return o @ params["wf"] + params["bf"]


def _init_params(key, C):
    """Deterministic synthetic init (Linear weight (out,in) -> stored transposed)."""
    bound = 1.0 / math.sqrt(C)
    keys = jax.random.split(key, 8)
    names = ["wq", "bq", "wk", "bk", "wv", "bv", "wf", "bf"]
    params = {}
    for i, name in enumerate(names):
        if name.startswith("w"):
            w = jax.random.uniform(keys[i], (C, C), jnp.float32, -bound, bound)
            params[name] = w.T                 # store as (C_in, C_out)
        else:
            params[name] = jax.random.uniform(keys[i], (C,), jnp.float32, -bound, bound)
    return params


if __name__ == "__main__":
    key = jax.random.PRNGKey(0)
    k_x, k_ctx, k_bias, k_p = jax.random.split(key, 4)

    B, N1, N2, C, H = 2, 8, 16, 32, 4   # query_dim per head = 8

    x = jax.random.normal(k_x, (B, N1, C), jnp.float32)
    context = jax.random.normal(k_ctx, (B, N2, C), jnp.float32)
    attn_bias = 0.1 * jax.random.normal(k_bias, (B, H, N1, N2), jnp.float32)
    params = _init_params(k_p, C)

    ref = _reference(x, context, params, num_heads=H, attn_bias=attn_bias)
    ref_nb = _reference(x, context, params, num_heads=H, attn_bias=None)

    # f32 compute path (exact reciprocal): tight check.
    out_f32 = relative_attention(x, context, params, num_heads=H,
                                 attn_bias=attn_bias, compute_dtype=jnp.float32)
    out_f32 = jax.block_until_ready(out_f32)
    assert out_f32.shape == (B, N1, C)
    assert jnp.allclose(out_f32, ref, atol=1e-3, rtol=1e-3), "f32 mismatch vs reference"

    # bf16 MXU path (default perf config): looser check.
    out_bf16 = relative_attention(x, context, params, num_heads=H, attn_bias=attn_bias)
    out_bf16 = jax.block_until_ready(out_bf16)
    assert jnp.allclose(out_bf16, ref, atol=5e-2, rtol=5e-2), "bf16 mismatch vs reference"

    # Specialized no-bias variant (no bias operand at all).
    out_nb = relative_attention(x, context, params, num_heads=H, attn_bias=None)
    out_nb = jax.block_until_ready(out_nb)
    assert jnp.allclose(out_nb, ref_nb, atol=5e-2, rtol=5e-2), "no-bias mismatch vs reference"

    print("KERNEL_OK")
</pallas_src>

<mosaic_0001>
module attributes {stable_mosaic.version = 11 : i64} {
  func.func @_rel_attn_kernel(%arg0: i32, %arg1: i32, %arg2: i32, %arg3: memref<1x8x32xf32, #tpu.memory_space<vmem>>, %arg4: memref<4x16x8xf32, #tpu.memory_space<vmem>>, %arg5: memref<4x16x8xf32, #tpu.memory_space<vmem>>, %arg6: memref<1x1x8x16xf32, #tpu.memory_space<vmem>>, %arg7: memref<32x32xf32, #tpu.memory_space<vmem>>, %arg8: memref<1x32xf32, #tpu.memory_space<vmem>>, %arg9: memref<1x8x32xf32, #tpu.memory_space<vmem>>, %arg10: memref<1x32xf32, #tpu.memory_space<vmem>>, %arg11: memref<1x8x32xf32, #tpu.memory_space<vmem>>, %arg12: memref<4x8x8xf32, #tpu.memory_space<vmem>>, %arg13: memref<8x32xf32, #tpu.memory_space<vmem>>) attributes {dimension_semantics = [#tpu.dimension_semantics<parallel>, #tpu.dimension_semantics<parallel>, #tpu.dimension_semantics<arbitrary>], iteration_bounds = array<i64: 2, 1, 4>, scalar_prefetch = 0 : i64, scratch_operands = 2 : i64, tpu.core_type = #tpu.core_type<tc>, window_params = [{transform_indices = @transform_0, window_bounds = array<i64: 1, 8, 32>}, {transform_indices = @transform_1, window_bounds = array<i64: 4, 16, 8>}, {transform_indices = @transform_2, window_bounds = array<i64: 4, 16, 8>}, {transform_indices = @transform_3, window_bounds = array<i64: 1, 1, 8, 16>}, {pipeline_mode = #tpu.pipeline_mode<synchronous>, transform_indices = @transform_4, window_bounds = array<i64: 32, 32>}, {pipeline_mode = #tpu.pipeline_mode<synchronous>, transform_indices = @transform_5, window_bounds = array<i64: 1, 32>}, {transform_indices = @transform_6, window_bounds = array<i64: 1, 8, 32>}, {pipeline_mode = #tpu.pipeline_mode<synchronous>, transform_indices = @transform_7, window_bounds = array<i64: 1, 32>}, {transform_indices = @transform_8, window_bounds = array<i64: 1, 8, 32>}]} {
    %c0_i32 = arith.constant 0 : i32
    %0 = arith.cmpi eq, %arg2, %c0_i32 : i32
    %1 = arith.extui %0 : i1 to i32
    %c0_i32_0 = arith.constant 0 : i32
    %2 = arith.cmpi ne, %1, %c0_i32_0 : i32
    scf.if %2 {
      %c0_22 = arith.constant 0 : index
      %c0_23 = arith.constant 0 : index
      %c0_24 = arith.constant 0 : index
      %36 = vector.load %arg3[%c0_22, %c0_23, %c0_24] : memref<1x8x32xf32, #tpu.memory_space<vmem>>, vector<1x8x32xf32>
      %37 = vector.shape_cast %36 : vector<1x8x32xf32> to vector<8x32xf32>
      %c0_25 = arith.constant 0 : index
      %c0_26 = arith.constant 0 : index
      %38 = vector.load %arg7[%c0_25, %c0_26] : memref<32x32xf32, #tpu.memory_space<vmem>>, vector<32x32xf32>
      %cst_27 = arith.constant dense<0.000000e+00> : vector<8x32xf32>
      %39 = tpu.matmul %37, %38, %cst_27 {dimension_numbers = #tpu.dot_dimension_numbers<[1], [0], [0], [1], [0, 0, 1, 1], [], []>} : vector<8x32xf32>, vector<32x32xf32>, vector<8x32xf32> -> vector<8x32xf32>
      %c0_28 = arith.constant 0 : index
      %c0_29 = arith.constant 0 : index
      %40 = vector.load %arg8[%c0_28, %c0_29] : memref<1x32xf32, #tpu.memory_space<vmem>>, vector<1x32xf32>
      %41 = vector.broadcast %40 : vector<1x32xf32> to vector<8x32xf32>
      %42 = arith.addf %39, %41 : vector<8x32xf32>
      %43 = vector.extract_strided_slice %42 {offsets = [0, 0], sizes = [8, 8], strides = [1, 1]} : vector<8x32xf32> to vector<8x8xf32>
      %c0_30 = arith.constant 0 : index
      %c0_31 = arith.constant 0 : index
      %c0_32 = arith.constant 0 : index
      %44 = vector.load %arg12[%c0_30, %c0_31, %c0_32] : memref<4x8x8xf32, #tpu.memory_space<vmem>>, vector<1x8x8xf32>
      %45 = vector.shape_cast %44 : vector<1x8x8xf32> to vector<8x8xf32>
      %46 = vector.shape_cast %43 : vector<8x8xf32> to vector<1x8x8xf32>
      tpu.vector_store %arg12[%c0_30, %c0_31, %c0_32], %46 {strides = array<i32>} : memref<4x8x8xf32, #tpu.memory_space<vmem>>, vector<1x8x8xf32>,
      %47 = vector.extract_strided_slice %42 {offsets = [0, 8], sizes = [8, 8], strides = [1, 1]} : vector<8x32xf32> to vector<8x8xf32>
      %c1 = arith.constant 1 : index
      %c0_33 = arith.constant 0 : index
      %c0_34 = arith.constant 0 : index
      %48 = vector.load %arg12[%c1, %c0_33, %c0_34] : memref<4x8x8xf32, #tpu.memory_space<vmem>>, vector<1x8x8xf32>
      %49 = vector.shape_cast %48 : vector<1x8x8xf32> to vector<8x8xf32>
      %50 = vector.shape_cast %47 : vector<8x8xf32> to vector<1x8x8xf32>
      tpu.vector_store %arg12[%c1, %c0_33, %c0_34], %50 {strides = array<i32>} : memref<4x8x8xf32, #tpu.memory_space<vmem>>, vector<1x8x8xf32>,
      %51 = vector.extract_strided_slice %42 {offsets = [0, 16], sizes = [8, 8], strides = [1, 1]} : vector<8x32xf32> to vector<8x8xf32>
      %c2 = arith.constant 2 : index
      %c0_35 = arith.constant 0 : index
      %c0_36 = arith.constant 0 : index
      %52 = vector.load %arg12[%c2, %c0_35, %c0_36] : memref<4x8x8xf32, #tpu.memory_space<vmem>>, vector<1x8x8xf32>
      %53 = vector.shape_cast %52 : vector<1x8x8xf32> to vector<8x8xf32>
      %54 = vector.shape_cast %51 : vector<8x8xf32> to vector<1x8x8xf32>
      tpu.vector_store %arg12[%c2, %c0_35, %c0_36], %54 {strides = array<i32>} : memref<4x8x8xf32, #tpu.memory_space<vmem>>, vector<1x8x8xf32>,
      %55 = vector.extract_strided_slice %42 {offsets = [0, 24], sizes = [8, 8], strides = [1, 1]} : vector<8x32xf32> to vector<8x8xf32>
      %c3 = arith.constant 3 : index
      %c0_37 = arith.constant 0 : index
      %c0_38 = arith.constant 0 : index
      %56 = vector.load %arg12[%c3, %c0_37, %c0_38] : memref<4x8x8xf32, #tpu.memory_space<vmem>>, vector<1x8x8xf32>
      %57 = vector.shape_cast %56 : vector<1x8x8xf32> to vector<8x8xf32>
      %58 = vector.shape_cast %55 : vector<8x8xf32> to vector<1x8x8xf32>
      tpu.vector_store %arg12[%c3, %c0_37, %c0_38], %58 {strides = array<i32>} : memref<4x8x8xf32, #tpu.memory_space<vmem>>, vector<1x8x8xf32>,
      %cst_39 = arith.constant 0.000000e+00 : f32
      %59 = vector.broadcast %cst_39 : f32 to vector<8x32xf32>
      %c0_40 = arith.constant 0 : index
      %c0_41 = arith.constant 0 : index
      %60 = vector.load %arg13[%c0_40, %c0_41] : memref<8x32xf32, #tpu.memory_space<vmem>>, vector<8x32xf32>
      tpu.vector_store %arg13[%c0_40, %c0_41], %59 {strides = array<i32>} : memref<8x32xf32, #tpu.memory_space<vmem>>, vector<8x32xf32>,
    } else {
    }
    %3 = arith.index_cast %arg2 : i32 to index
    %c0 = arith.constant 0 : index
    %c0_1 = arith.constant 0 : index
    %4 = vector.load %arg12[%3, %c0, %c0_1] : memref<4x8x8xf32, #tpu.memory_space<vmem>>, vector<1x8x8xf32>
    %5 = vector.shape_cast %4 : vector<1x8x8xf32> to vector<8x8xf32>
    %6 = arith.index_cast %arg2 : i32 to index
    %c0_2 = arith.constant 0 : index
    %c0_3 = arith.constant 0 : index
    %7 = vector.load %arg4[%6, %c0_2, %c0_3] : memref<4x16x8xf32, #tpu.memory_space<vmem>>, vector<1x16x8xf32>
    %8 = vector.shape_cast %7 : vector<1x16x8xf32> to vector<16x8xf32>
    %9 = arith.index_cast %arg2 : i32 to index
    %c0_4 = arith.constant 0 : index
    %c0_5 = arith.constant 0 : index
    %10 = vector.load %arg5[%9, %c0_4, %c0_5] : memref<4x16x8xf32, #tpu.memory_space<vmem>>, vector<1x16x8xf32>
    %11 = vector.shape_cast %10 : vector<1x16x8xf32> to vector<16x8xf32>
    %cst = arith.constant dense<0.000000e+00> : vector<8x16xf32>
    %12 = tpu.matmul %5, %8, %cst {dimension_numbers = #tpu.dot_dimension_numbers<[1], [1], [0], [0], [0, 0, 1, 0], [], []>} : vector<8x8xf32>, vector<16x8xf32>, vector<8x16xf32> -> vector<8x16xf32>
    %c0_6 = arith.constant 0 : index
    %c0_7 = arith.constant 0 : index
    %c0_8 = arith.constant 0 : index
    %c0_9 = arith.constant 0 : index
    %13 = vector.load %arg6[%c0_6, %c0_7, %c0_8, %c0_9] : memref<1x1x8x16xf32, #tpu.memory_space<vmem>>, vector<1x1x8x16xf32>
    %14 = vector.shape_cast %13 : vector<1x1x8x16xf32> to vector<8x16xf32>
    %15 = arith.addf %12, %14 : vector<8x16xf32>
    %cst_10 = arith.constant dense<0xFF800000> : vector<8xf32>
    %16 = vector.multi_reduction <maximumf>, %15, %cst_10 [1] : vector<8x16xf32> to vector<8xf32>
    %17 = vector.shape_cast %16 : vector<8xf32> to vector<8x1xf32>
    %18 = vector.broadcast %17 : vector<8x1xf32> to vector<8x16xf32>
    %19 = arith.subf %15, %18 : vector<8x16xf32>
    %20 = math.exp %19 : vector<8x16xf32>
    %cst_11 = arith.constant dense<0.000000e+00> : vector<8xf32>
    %21 = vector.multi_reduction <add>, %20, %cst_11 [1] : vector<8x16xf32> to vector<8xf32>
    %22 = vector.shape_cast %21 : vector<8xf32> to vector<8x1xf32>
    %cst_12 = arith.constant dense<0.000000e+00> : vector<8x8xf32>
    %23 = tpu.matmul %20, %11, %cst_12 {dimension_numbers = #tpu.dot_dimension_numbers<[1], [0], [0], [1], [0, 0, 1, 1], [], []>} : vector<8x16xf32>, vector<16x8xf32>, vector<8x8xf32> -> vector<8x8xf32>
    %24 = tpu.reciprocal %22 : vector<8x1xf32> -> vector<8x1xf32>
    %25 = vector.broadcast %24 : vector<8x1xf32> to vector<8x8xf32>
    %26 = arith.mulf %23, %25 : vector<8x8xf32>
    %c0_13 = arith.constant 0 : index
    %c0_14 = arith.constant 0 : index
    %27 = vector.load %arg13[%c0_13, %c0_14] : memref<8x32xf32, #tpu.memory_space<vmem>>, vector<8x32xf32>
    %c0_15 = arith.constant 0 : index
    %c0_16 = arith.constant 0 : index
    %c0_17 = arith.constant 0 : index
    %28 = vector.load %arg9[%c0_15, %c0_16, %c0_17] : memref<1x8x32xf32, #tpu.memory_space<vmem>>, vector<1x8x32xf32>
    %29 = vector.shape_cast %28 : vector<1x8x32xf32> to vector<8x32xf32>
    %cst_18 = arith.constant dense<0.000000e+00> : vector<8x32xf32>
    %30 = tpu.matmul %26, %29, %cst_18 {dimension_numbers = #tpu.dot_dimension_numbers<[1], [0], [0], [1], [0, 0, 1, 1], [], []>} : vector<8x8xf32>, vector<8x32xf32>, vector<8x32xf32> -> vector<8x32xf32>
    %31 = arith.addf %27, %30 : vector<8x32xf32>
    %c0_19 = arith.constant 0 : index
    %c0_20 = arith.constant 0 : index
    %32 = vector.load %arg13[%c0_19, %c0_20] : memref<8x32xf32, #tpu.memory_space<vmem>>, vector<8x32xf32>
    tpu.vector_store %arg13[%c0_19, %c0_20], %31 {strides = array<i32>} : memref<8x32xf32, #tpu.memory_space<vmem>>, vector<8x32xf32>,
    %c3_i32 = arith.constant 3 : i32
    %33 = arith.cmpi eq, %arg2, %c3_i32 : i32
    %34 = arith.extui %33 : i1 to i32
    %c0_i32_21 = arith.constant 0 : i32
    %35 = arith.cmpi ne, %34, %c0_i32_21 : i32
    scf.if %35 {
      %c0_22 = arith.constant 0 : index
      %c0_23 = arith.constant 0 : index
      %36 = vector.load %arg13[%c0_22, %c0_23] : memref<8x32xf32, #tpu.memory_space<vmem>>, vector<8x32xf32>
      %c0_24 = arith.constant 0 : index
      %c0_25 = arith.constant 0 : index
      %37 = vector.load %arg10[%c0_24, %c0_25] : memref<1x32xf32, #tpu.memory_space<vmem>>, vector<1x32xf32>
      %38 = vector.broadcast %37 : vector<1x32xf32> to vector<8x32xf32>
      %39 = arith.addf %36, %38 : vector<8x32xf32>
      %c0_26 = arith.constant 0 : index
      %c0_27 = arith.constant 0 : index
      %c0_28 = arith.constant 0 : index
      %40 = vector.load %arg11[%c0_26, %c0_27, %c0_28] : memref<1x8x32xf32, #tpu.memory_space<vmem>>, vector<1x8x32xf32>
      %41 = vector.shape_cast %40 : vector<1x8x32xf32> to vector<8x32xf32>
      %42 = vector.shape_cast %39 : vector<8x32xf32> to vector<1x8x32xf32>
      tpu.vector_store %arg11[%c0_26, %c0_27, %c0_28], %42 {strides = array<i32>} : memref<1x8x32xf32, #tpu.memory_space<vmem>>, vector<1x8x32xf32>,
    } else {
    }
    return
  }
  func.func @transform_0(%arg0: i32, %arg1: i32, %arg2: i32) -> (i32, i32, i32) {
    %c0_i32 = arith.constant 0 : i32
    %c0_i32_0 = arith.constant 0 : i32
    return %arg0, %arg1, %c0_i32 : i32, i32, i32
  }
  func.func @transform_1(%arg0: i32, %arg1: i32, %arg2: i32) -> (i32, i32, i32) {
    %c0_i32 = arith.constant 0 : i32
    %c0_i32_0 = arith.constant 0 : i32
    %c0_i32_1 = arith.constant 0 : i32
    return %arg0, %c0_i32, %c0_i32_0 : i32, i32, i32
  }
  func.func @transform_2(%arg0: i32, %arg1: i32, %arg2: i32) -> (i32, i32, i32) {
    %c0_i32 = arith.constant 0 : i32
    %c0_i32_0 = arith.constant 0 : i32
    %c0_i32_1 = arith.constant 0 : i32
    return %arg0, %c0_i32, %c0_i32_0 : i32, i32, i32
  }
  func.func @transform_3(%arg0: i32, %arg1: i32, %arg2: i32) -> (i32, i32, i32, i32) {
    %c0_i32 = arith.constant 0 : i32
    %c0_i32_0 = arith.constant 0 : i32
    return %arg0, %arg2, %arg1, %c0_i32 : i32, i32, i32, i32
  }
  func.func @transform_4(%arg0: i32, %arg1: i32, %arg2: i32) -> (i32, i32) {
    %c0_i32 = arith.constant 0 : i32
    %c0_i32_0 = arith.constant 0 : i32
    %c0_i32_1 = arith.constant 0 : i32
    return %c0_i32, %c0_i32_0 : i32, i32
  }
  func.func @transform_5(%arg0: i32, %arg1: i32, %arg2: i32) -> (i32, i32) {
    %c0_i32 = arith.constant 0 : i32
    %c0_i32_0 = arith.constant 0 : i32
    %c0_i32_1 = arith.constant 0 : i32
    return %c0_i32, %c0_i32_0 : i32, i32
  }
  func.func @transform_6(%arg0: i32, %arg1: i32, %arg2: i32) -> (i32, i32, i32) {
    %c0_i32 = arith.constant 0 : i32
    %c0_i32_0 = arith.constant 0 : i32
    %c0_i32_1 = arith.constant 0 : i32
    return %arg2, %c0_i32, %c0_i32_0 : i32, i32, i32
  }
  func.func @transform_7(%arg0: i32, %arg1: i32, %arg2: i32) -> (i32, i32) {
    %c0_i32 = arith.constant 0 : i32
    %c0_i32_0 = arith.constant 0 : i32
    %c0_i32_1 = arith.constant 0 : i32
    return %c0_i32, %c0_i32_0 : i32, i32
  }
  func.func @transform_8(%arg0: i32, %arg1: i32, %arg2: i32) -> (i32, i32, i32) {
    %c0_i32 = arith.constant 0 : i32
    %c0_i32_0 = arith.constant 0 : i32
    return %arg0, %arg1, %c0_i32 : i32, i32, i32
  }
}

</mosaic_0001>

<bundles_post_ra>
// kernel: tpu_custom_call.1
= control target key start
LH: loop header
LB: loop body
LE: loop exit
PB: predicated region body
PF: predicated region fallthrough
CT: control target
= control target key end

     0   :  { %s1495_s0 = inlined_call_operand.vmem [shape: f32[2,8,32], index: 0, kind: input, shape index: {}]   ;;  %s1496_s1 = inlined_call_operand.vmem [shape: f32[8,16,8], index: 1, kind: input, shape index: {}]   ;;  %s1497_s2 = inlined_call_operand.vmem [shape: f32[8,16,8], index: 2, kind: input, shape index: {}]   ;;  %s1498_s3 = inlined_call_operand.vmem [shape: f32[2,4,8,16], index: 3, kind: input, shape index: {}]   ;;  %s1499_s4 = inlined_call_operand.vmem [shape: f32[32,32], index: 4, kind: input, shape index: {}]   ;;  %s1500_s5 = inlined_call_operand.vmem [shape: f32[1,32], index: 5, kind: input, shape index: {}]   ;;  %s1501_s6 = inlined_call_operand.vmem [shape: f32[4,8,32], index: 6, kind: input, shape index: {}]   ;;  %s1502_s7 = inlined_call_operand.vmem [shape: f32[1,32], index: 7, kind: input, shape index: {}]   ;;  %s1503_s8 = inlined_call_operand.hbm [shape: f32[2,8,32], index: 8, kind: output, shape index: {}]  }
   0x1   :  { %1517 = sst [smem:[#allocation18_spill]] %s1503_s8 }
   0x2   :  { %13 = vsyncpa [#allocation5], 0 }
   0x3   :  { %15 = vsyncpa [#allocation5 + $0x1], 0  ;;  %s1299_s27 = smov 0   ;;  %s1301_s28 = smov 0  }
   0x4   :  { %s1303_s29 = smov 0   ;;  %s1305_s30 = smov 0  }
   0x5   :  { %s1307_s9 = smov 0   ;;  %s1309_s10 = smov 0  }
   0x6   :  { %s1311_s11 = smov 0   ;;  %s1313_s12 = smov 0  }
   0x7 LB: > { %1518 = sst [smem:[#allocation7_spill]] %s1214_s27  ;;  %s974_s13 = sadd.s32 4294967295, %s1242_s12   ;;  %s1242_s12 = sphi %s1313_s12, %s21_s12   ;;  %s1238_s11 = sphi %s1311_s11, %s1544_s11   ;;  %s1234_s10 = sphi %s1309_s10, %s1543_s10   ;;  %s1230_s9 = sphi %s1307_s9, %s1542_s9   ;;  %s1226_s30 = sphi %s1305_s30, %s1541_s30   ;;  %s1222_s29 = sphi %s1303_s29, %s1540_s29   ;;  %s1218_s28 = sphi %s1301_s28, %s1539_s28   ;;  %s1214_s27 = sphi %s1299_s27, %s1538_s27  }
   0x8   : > { %1519 = sst [smem:[#allocation8_spill]] %s1218_s28  ;;  %s975_s14 = sadd.s32 4294967294, %s1242_s12  }
   0x9   : > { %1520 = sst [smem:[#allocation9_spill]] %s1222_s29  ;;  %s33_s15 = sadd.s32 1, %s1234_s10 }
   0xa   : > { %1521 = sst [smem:[#allocation10_spill]] %s1234_s10  ;;  %p34_p0 = scmp.ge.s32.totalorder %s33_s15, 4 }
   0xb   : > { %1522 = sst [smem:[#allocation11_spill]] %s1238_s11  ;;  %s40_s16 = sadd.s32 1, %s1238_s11 }
   0xc   : > { %1523 = sst [smem:[#allocation12_spill]] %s1242_s12  ;;  %p258_p1 = scmp.ne.s32.totalorder %s1222_s29, %s1218_s28 }
   0xd   : > { %p259_p2 = scmp.eq.s32.totalorder %s974_s13, 7  ;;  %s1546_s15 = smov (%p34_p0, %s33_s15), 0 }
   0xe   : > { %1524 = sst [smem:[#allocation13_spill]] %s1546_s15  ;;  %s1548_s16 = smov (!%p34_p0, %s40_s16), %s1238_s11 }
   0xf   : > { %p1348_p3 = por %p259_p2, %p258_p1  ;;  %p264_p4 = scmp.ne.s32.totalorder %s1218_s28, %s1214_s27 }
  0x10   : > { %p42_p5 = scmp.ge.s32.totalorder %s1548_s16, 2  ;;  %p265_p6 = scmp.eq.s32.totalorder %s975_s14, 7 }
  0x11   : > { %s1525_s17 = scalar_select %p1348_p3, 1, 0 }
  0x12   : > { %p978_p7 = scmp.ge.s32.totalorder %s1242_s12, 1  ;;  %p343_p8 = scmp.lt.s32.totalorder %s1242_s12, 9 }
  0x13   : > { %1526 = sst [smem:[#allocation14_spill]] %s1525_s17  ;;  %s1550_s16 = smov (%p42_p5, %s1548_s16), 0 }
  0x14   : > { %1527 = sst [smem:[#allocation15_spill]] %s1550_s16  ;;  %p1358_p9 = por %p265_p6, %p264_p4 }
  0x15   : > { %p344_p10 = pnand %p978_p7, %p343_p8  ;;  %s243_s19 = ssub.s32 %s1238_s11, %s1550_s16 }
  0x16   : > { %s1528_s18 = scalar_select %p1358_p9, 1, 0 }
  0x17   : > { %s248_s20 = sadd.s32 1, %s1222_s29  ;;  %p246_p11 = scmp.eq.s32.totalorder %s243_s19, 0 }
  0x18   : > { %1529 = sst [smem:[#allocation16_spill]] %s1528_s18  ;;  %347 = sbr.rel (%p344_p10) target bundleno = 1224 (0x4c8), region = 52 }
  0x19   : > { %s1366_s21 = scalar_select %p246_p11, %s1222_s29, %s248_s20  }
  0x1a   : > { %s1507_s22 = sand.u32 (!%p344_p10), 1, %s1218_s28   ;;  %p406_p12 = scmp.lt.s32.totalorder (!%p344_p10), %s1230_s9, 1 }
  0x1b   : > { %1530 = sst [smem:[#allocation17_spill]] %s1366_s21  ;;  %s1372_s23 = sshll.u32 (!%p344_p10), %s1507_s22, 3 }
  0x1c   : > { %s981_s24 = sshll.u32 (!%p344_p10), %s1230_s9, 2  ;;  %p429_p0 = scmp.lt.s32.totalorder (!%p344_p10), %s1226_s30, 3 }
  0x1d   : > { %p414_p13 = scmp.lt.s32.totalorder (!%p344_p10), %s981_s24, 7  ;;  %s405_s16 = scalar_lea.vmem (!%p344_p10), [#allocation4], %s1372_s23 }
  0x1e   : > { %p990_p1 = scmp.ne.s32.totalorder (!%p344_p10), %s1226_s30, 0 }
  0x1f   : > { %s407_s25 = scalar_select %p406_p12, %s1230_s9, 1 }
  0x20   : > { %s1552_s24 = smov (!%p414_p13, %s981_s24), 7  ;;  %v447_v0 = vld [vmem:[%s1499_s4] sm:$0xff] (!%p990_p1)  ;;  %v448_v1 = vld [vmem:[%s1499_s4 + $0x8] sm:$0xff] (!%p990_p1)  ;;  %v449_v2 = vld [vmem:[%s1499_s4 + $0x10] sm:$0xff] (!%p990_p1)  ;;  %v1244_v3 = vmov (!%p990_p1), 0.0|0.0   ;;  %vm458_vm0 = vcmask (!%p990_p1), 261120  }
  0x21   : > { %s980_s26 = sshll.u32 %s407_s25, 3  ;;  %s1006_s20 = sshll.u32 %s1552_s24, 4  ;;  %1051 = vmatprep.subr.bf16.mxu0 (!%p990_p1), %v1244_v3  ;;  %v1052_v4 = vpack.c.bf16 (!%p990_p1), %v448_v1, %v447_v0  ;;  %v450_v5 = vld [vmem:[%s1499_s4 + $0x18] sm:$0xff] (!%p990_p1)  ;;  %vm1245_vm1 = vmmov (!%p990_p1), 0   ;;  %v1246_v6 = vmov (!%p990_p1), 0.0   ;;  %vm532_vm2 = vcmask (!%p990_p1), 64512  }
  0x22   : > { %s412_s19 = scalar_lea.vmem %s1495_s0, %s980_s26  ;;  %s1383_s11 = scalar_lea.vmem %s1496_s1, %s1006_s20  ;;  %1029 = vmatprep.mubr.msk.f32.mxu0 (!%p990_p1), %vm1245_vm1, %v1246_v6  ;;  %550 = vst.msk [vmem:[#allocation3] sm:$0xff] (!%p990_p1), %vm458_vm0, %v1246_v6  ;;  %v1055_v7 = vpack.c.bf16 (!%p990_p1), %v450_v5, %v449_v2  ;;  %v991_v9 = vld [vmem:[%s1500_s5] ss:$0 sm:$0xff] (!%p990_p1) }
  0x23   : > { %s1388_s21 = scalar_lea.vmem %s1497_s2, %s1006_s20  ;;  %s987_s18 = sshll.u32 %s407_s25, 2  ;;  %1053 = vmatpush3.bf16.msra.mxu0 (!%p990_p1), %v1052_v4  ;;  %v446_v8 = vld [vmem:[%s412_s19] sm:$0xff] (!%p990_p1) }
  0x24   : > { %s430_s29 = scalar_select %p429_p0, %s1226_s30, 3 }
  0x25   : > { %445 = sbr.rel (%p990_p1) target bundleno = 376 (0x178), region = 56  ;;  %1054 = vmatprep.subr.bf16.mxu0 (!%p990_p1), %v1244_v3  ;;  %s1247_s14 = smov (!%p990_p1), 104  }
  0x26   : > { %s435_s27 = sadd.s32 %s987_s18, %s430_s29  ;;  %s989_s12 = sshll.u32 %s430_s29, 3 }
  0x27   : > { %s988_s8 = sshll.u32 %s435_s27, 3  ;;  %s1394_s26 = scalar_lea.vmem %s1501_s6, %s989_s12  ;;  %1056 = vmatpush3.bf16.msra.mxu0 (!%p990_p1), %v1055_v7 }
  0x28   : > { %s1399_s15 = scalar_lea.vmem %s1498_s3, %s988_s8  ;;  %s1248_s20 = smov (!%p990_p1), 120  }
  0x29   : > { %s1249_s24 = smov (!%p990_p1), 112  }
  0x2a   : > { %1030 = vmatmul.mubr.msk.f32.vlgmr.msra.gmra.mrb[0].mxu0 (!%p990_p1), %vm458_vm0, %v446_v8 }
  0xfd   : > { %v528_v10 = vpop.f32.mrb[0].mxu0 }
  0xfe   : > { %v529_v11 = vadd.f32 %v991_v9, %v528_v10  ;;  %v1031_v12 = vpop.f32.mrb[1].mxu0 }
 0x100   : > { %545 = vrot.lane.b32.xlu1 %v529_v11, %s1247_s14  ;;  %535 = vrot.lane.b32.xlu0 %v529_v11, %s1248_s20  ;;  %533 = vst.msk [vmem:[#allocation2] sm:$0xff] %vm532_vm2, %v529_v11 }
 0x104   : > { %540 = vrot.lane.b32.xlu0 %v529_v11, %s1249_s24 }
 0x172   : > { %v546_v13 = vpop.permute.xlu1 %545  ;;  %v536_v14 = vpop.permute.xlu0 %535 }
 0x173   : > { %549 = vst.msk [vmem:[#allocation2 + $0x18] sm:$0xff] %vm532_vm2, %v546_v13  ;;  %539 = vst.msk [vmem:[#allocation2 + $0x8] sm:$0xff] %vm532_vm2, %v536_v14 }
 0x176   : > { %v541_v15 = vpop.permute.xlu0 %540 }
 0x177   : > { %544 = vst.msk [vmem:[#allocation2 + $0x10] sm:$0xff] %vm532_vm2, %v541_v15 }
 0x178 PF: > { %s994_s19 = sshll.u32 %s1226_s30, 4  ;;  %vm562_vm3 = vcmask 64512   ;;  %v1250_v16 = vmov 0.0|0.0   ;;  %vm1251_vm4 = vmmov 0   ;;  %v1252_v17 = vmov 0.0   ;;  %s993_s10 = sshll.u32 %s1226_s30, 3 }
 0x179   : > { %1057 = vmatprep.subr.bf16.mxu0 %v1250_v16  ;;  %s555_s13 = scalar_lea.vmem %s1383_s11, %s994_s19  ;;  %1036 = vmatprep.mubr.msk.f32.mxu0 %vm1251_vm4, %v1252_v17  ;;  %vm1059_vm5 = vmpackc.low %vm562_vm3, %vm562_vm3  ;;  %s552_s22 = scalar_lea.vmem [#allocation2], %s993_s10  ;;  %v561_v22 = vld [vmem:[%s1399_s15] sm:$0xff]  ;;  %vm642_vm6 = vcmask 130048   ;;  %vm803_vm7 = vcmask 261120  }
 0x17a   : > { %v556_v18 = vld [vmem:[%s555_s13] sm:$0xff]  ;;  %v557_v19 = vld [vmem:[%s555_s13 + $0x8] sm:$0xff]  ;;  %1061 = vmatprep.subr.bf16.mxu1 %v1250_v16  ;;  %1043 = vmatprep.mubr.msk.f32.mxu1 %vm1251_vm4, %v1252_v17  ;;  %s558_s11 = scalar_lea.vmem %s1388_s21, %s994_s19  ;;  %p1000_p2 = scmp.ne.s32.totalorder %s1226_s30, 3 }
 0x17b   : > { %v1058_v20 = vpack.c.bf16 %v557_v19, %v556_v18  ;;  %v559_v27 = vld [vmem:[%s558_s11] sm:$0xff]  ;;  %v560_v28 = vld [vmem:[%s558_s11 + $0x8] sm:$0xff] }
 0x17c   : > { %v1062_v29 = vpack.c.bf16 %v560_v28, %v559_v27  ;;  %v728_v35 = vld [vmem:[%s1394_s26] sm:$0xff] }
 0x17d   : > { %1060 = vmatpush3.bf16.xpose.msk.msra.mxu0 %vm1059_vm5, %v1058_v20  ;;  %v727_v41 = vld [vmem:[#allocation3] sm:$0xff] }
 0x17e   : > { %v553_v21 = vld [vmem:[%s552_s22] sm:$0xff]  ;;  %1063 = vmatpush3.bf16.msra.mxu1 %v1062_v29 }
 0x17f   : > { %1046 = vmatprep.subr.mxu1 %v1252_v17  ;;  %v1001_v46 = vld [vmem:[%s1502_s7] ss:$0 sm:$0xff] (!%p1000_p2) }
 0x184   : > { %1037 = vmatmul.mubr.msk.f32.vlgmr.msra.gmra.mrb[0].mxu0 %vm562_vm3, %v553_v21 }
 0x257   : > { %v638_v23 = vpop.f32.mrb[0].mxu0 }
 0x258   : > { %v639_v24 = vadd.f32 %v638_v23, %v561_v22  ;;  %v1038_v25 = vpop.f32.mrb[1].mxu0 }
 0x25a   : > { %v643_v26 = vsel %vm642_vm6, %v639_v24, -inf }
 0x25b   : > { %644 = vmax.xlane.f32.xlu0 %v643_v26 }
 0x2e8   : > { %v645_v30 = vpop.xlane.xlu0 %644 }
 0x2e9   : > { %v646_v31 = vsub.f32 %v639_v24, %v645_v30 }
 0x2eb   : > { %v647_v32 = vmul.f32 1.442695, %v646_v31 }
 0x2ed   : > { %1144 = vpow2.f32 %v647_v32 }
 0x2f7   : > { %v1145_v33 = vpop.eup %1144 }
 0x2f8   : > { %1044 = vmatmul.mubr.msk.f32.vlgmr.msra.gmra.mrb[0].mxu1 %vm642_vm6, %v1145_v33  ;;  %v649_v34 = vsel %vm642_vm6, %v1145_v33, 0.0 }
 0x2f9   : > { %650 = vadd.xlane.f32.xlu0 %v649_v34  ;;  %1048 = vmatprep.mubr.msk.f32.mxu1 %vm1251_vm4, %v1252_v17 }
 0x2fa   : > { %1047 = vmatpush3.msra.mxu1 %v728_v35 }
 0x386   : > { %v651_v36 = vpop.xlane.xlu0 %650 }
 0x387   : > { %1146 = vrcp.f32 %v651_v36 }
 0x391   : > { %v1147_v37 = vpop.eup %1146 }
 0x3cb   : > { %v721_v38 = vpop.f32.mrb[0].mxu1 }
 0x3cc   : > { %v726_v39 = vmul.f32 %v1147_v37, %v721_v38  ;;  %v1045_v40 = vpop.f32.mrb[1].mxu1 }
 0x3ce   : > { %1049 = vmatmul.mubr.msk.f32.vlgmr.msra.gmra.mrb[2].mxu1 %vm562_vm3, %v726_v39 }
 0x49e   : > { %808 = sbr.rel (%p1000_p2) target bundleno = 1199 (0x4af), region = 60 }
 0x4a1   : > { %v798_v42 = vpop.f32.mrb[2].mxu1 }
 0x4a2   : > { %v802_v43 = vadd.f32 %v798_v42, %v727_v41  ;;  %v1050_v44 = vpop.f32.mrb[3].mxu1 }
 0x4a4   : > { %804 = vst.msk [vmem:[#allocation3] sm:$0xff] %vm803_vm7, %v802_v43 }
 0x4ab   : > { %v809_v45 = vld [vmem:[#allocation3] sm:$0xff] }
 0x4ac   : > { %v817_v47 = vadd.f32 %v1001_v46, %v809_v45 }
 0x4ae   : > { %818 = vst.msk [vmem:[%s405_s16] sm:$0xff] %vm803_vm7, %v817_v47 }
 0x4af PF: > { %s1531_s15 = sld [smem:[#allocation8_spill]]  ;;  %s1003_s27 = sshll.u32 %s1230_s9, 7 }
 0x4b0   : > { %s1533_s8 = sld [smem:[#allocation18_spill]]  ;;  %s834_s17 = sshll.u32 %s405_s16, 4  ;;  %s835_s17 = int_to_ptr.vmem [resolvable:$true] %s834_s17 }
 0x4b1   : > { %s1148_s14 = scalar_lea.vmem %s835_s17, 128  ;;  %s1253_s20 = smov [#allocation4]  }
 0x4b2   : > { %p1149_p4 = scmp.ne.s32.totalorder %s835_s17, %s1148_s14  ;;  %s1152_s24 = sshll.u32 %s1253_s20, 4  ;;  %s1153_s24 = int_to_ptr.vmem [resolvable:$false] %s1152_s24 }
 0x4b3   : > { %s1154_s19 = scalar_lea.vmem %s1153_s24, 256  ;;  %p1155_p7 = scmp.lt.s32.totalorder %s835_s17, %s1153_s24 }
 0x4b4   : > { %p1150_p5 = pnand %p1149_p4, %p1348_p3  ;;  %p1156_p8 = scmp.lt.s32.totalorder %s1154_s19, %s1148_s14 }
 0x4b5   : > { %s1534_s18 = sand.u32 1, %s1531_s15  }
 0x4b6   : > { %s1444_s30 = scalar_lea.hbm %s1533_s8, %s1003_s27  ;;  %s820_s25 = scalar_lea.sflag [#allocation5], %s1534_s18 }
 0x4b7   : > { %p1151_p6 = pneg %p1150_p5  ;;  %p1157_p10 = por %p1156_p8, %p1155_p7 }
 0x4b9   : > { %p1158_p11 = pnand %p1157_p10, %p1151_p6 }
 0x4bb   : > { %1161 = shalt.err (!%p1158_p11)
}
 0x4bc   : > { %s1162_s9 = scalar_lea.hbm %s1444_s30, 128  ;;  %s1166_s13 = scalar_lea.hbm %s1533_s8, 256 }
 0x4bd   : > { %p1163_p12 = scmp.ne.s32.totalorder %s1444_s30, %s1162_s9  ;;  %p1167_p1 = scmp.lt.u32.totalorder %s1444_s30, %s1533_s8 }
 0x4be   : > { %p1168_p2 = scmp.lt.u32.totalorder %s1166_s13, %s1162_s9  ;;  %p1170_p5 = scmp.lt.u32.totalorder %s1162_s9, %s1444_s30 }
 0x4bf   : > { %p1164_p13 = pnand %p1163_p12, %p1348_p3 }
 0x4c0   : > { %p1169_p4 = por %p1168_p2, %p1167_p1 }
 0x4c1   : > { %p1165_p0 = pneg %p1164_p13 }
 0x4c2   : > { %p1171_p6 = por %p1170_p5, %p1169_p4 }
 0x4c4   : > { %p1172_p7 = pnand %p1171_p6, %p1165_p0 }
 0x4c6   : > { %1175 = shalt.err (!%p1172_p7)
}
 0x4c7   : > { %1064 = dma.vmem_to_hbm [thread:$0]  (%p1348_p3), %s835_s17, 128, %s1444_s30, %s820_s25  }
 0x4c8 PF: > { %s1535_s11 = sld [smem:[#allocation12_spill]]  ;;  %s1536_s21 = sld [smem:[#allocation7_spill]] }
 0x4ce   : > { %p1070_p8 = scmp.ge.s32.totalorder %s1535_s11, 2  ;;  %s846_s15 = sand.u32 1, %s1536_s21  }
 0x4cf   : > { %s847_s27 = scalar_lea.sflag [#allocation5], %s846_s15 }
 0x4d0   : > { %p1067_p10 = pnand %p1070_p8, %p1358_p9 }
 0x4d2   : > { %1209 = dma.done.wait (!%p1067_p10), %s847_s27, 128  }
 0x4d3   : > { %1211 = vsyncadd (!%p1067_p10), %s847_s27, 4294967168  ;;  %s21_s12 = sadd.s32 1, %s1535_s11   ;;  %s1538_s27 = sld [smem:[#allocation8_spill]] }
 0x4d4   : > { %p18_p11 = scmp.ge.s32.totalorder %s21_s12, 10   ;;  %s1539_s28 = sld [smem:[#allocation9_spill]] }
 0x4d5   : > { %s1540_s29 = sld [smem:[#allocation17_spill]]  ;;  %s1541_s30 = sld [smem:[#allocation10_spill]] }
 0x4d6   : > { %s1542_s9 = sld [smem:[#allocation11_spill]]  ;;  %s1543_s10 = sld [smem:[#allocation13_spill]] }
 0x4d7   : > { %s1544_s11 = sld [smem:[#allocation15_spill]]  ;;  %20 = sbr.rel (!%p18_p11) target bundleno = 7 (0x7), region = 113 }
 0x4de   :  { %852 = vsyncpa [#allocation5], 1 }
 0x4df   :  { %854 = vsyncpa [#allocation5 + $0x1], 1 }

</bundles_post_ra>
